<compile_context>
chip_gen: v6e
topology: v6e:2x2x1
jax: 0.10.0
libtpu: 0.0.40
codegen_flags: <defaults>
</compile_context>

<pallas_src>
import math

import numpy as np
import jax
import jax.numpy as jnp
from jax.experimental import pallas as pl
from jax.experimental.pallas import tpu as pltpu


def _silu(x):
    return x * jax.nn.sigmoid(x)


def _round_up(x, m):
    return ((x + m - 1) // m) * m


# --------------------------------------------------------------------------- #
# Per-generation tuning: VMEM budget, tile sizes, pipeline depth
# --------------------------------------------------------------------------- #
def _tpu_setup():
    kind = ""
    try:
        kind = jax.devices()[0].device_kind.lower()
    except Exception:
        pass
    vmem_cap = None
    try:
        vmem_cap = int(pltpu.get_tpu_info().vmem_capacity_bytes)
    except Exception:
        vmem_cap = None
    if vmem_cap is None:
        if "v7" in kind:
            vmem_cap = 64 * 1024 * 1024
        elif any(v in kind for v in ("v4", "v5", "v6")):
            vmem_cap = 128 * 1024 * 1024
        else:
            vmem_cap = 64 * 1024 * 1024            # conservative default
    small_vmem = vmem_cap <= 72 * 1024 * 1024      # v7x: 64 MiB per TensorCore
    wide_mxu = ("v6" in kind) or ("v7" in kind)    # 2x256x256 MXU generations

    if small_vmem:
        # leave headroom for compiler internal scratch / semaphores / data tiles
        vmem_limit = min(40 * 1024 * 1024, vmem_cap - 16 * 1024 * 1024)
        t_proj = 256
    else:
        vmem_limit = min(100 * 1024 * 1024, int(0.8 * vmem_cap))
        t_proj = 512                               # ~85% HBM roofline on 128 MiB parts
    vmem_limit = max(vmem_limit, 16 * 1024 * 1024)

    if wide_mxu:
        t_q = t_k = 256                            # fill the 256-wide MXU, halve steps
        kv_buffers = None                          # default depth-2 is enough at >=1.4 TB/s
    else:
        t_q = t_k = 128                            # v5e: 128x128 MXU, EUP-bound anyway
        kv_buffers = 3                             # hide k/v DMA at ~0.8 TB/s HBM
    return dict(vmem_limit=vmem_limit, t_proj=t_proj, t_q=t_q, t_k=t_k,
                kv_buffers=kv_buffers)


def _spec(shape, index_map, buffers=None):
    """BlockSpec with an optional explicit pipeline depth (falls back if unsupported)."""
    if buffers is None or not hasattr(pl, "Buffered"):
        return pl.BlockSpec(shape, index_map)
    try:
        return pl.BlockSpec(shape, index_map, pipeline_mode=pl.Buffered(buffers))
    except TypeError:
        return pl.BlockSpec(shape, index_map)


def _bcast_spec(shape):
    # Constant index_map -> double-buffering buys zero overlap; single-buffer the weights.
    nd = len(shape)
    return _spec(shape, lambda *args, nd=nd: (0,) * nd, buffers=1)


# --------------------------------------------------------------------------- #
# Kernel 1: per-position projections (LN'd x -> v ; fused mx_proj -> u, z, r, hx ; q, k)
# --------------------------------------------------------------------------- #
def make_proj_kernel(scaling, D, Z, V, off_z, off_r, off_hx):
    def kernel(xn_ref, mxe_ref, vw_ref, vb_ref, mxw_ref, mxb_ref,
               gam_ref, bet_ref,
               q_out, k_out, v_out, u_out, r_out, hx_out):
        xn = xn_ref[0]                                            # (Tp, D) bf16
        mx = _silu(mxe_ref[0].astype(jnp.float32))                # (Tp, D) f32
        mx16 = mx.astype(jnp.bfloat16)

        # value projection
        v = _silu(jnp.dot(xn, vw_ref[...],
                          preferred_element_type=jnp.float32) + vb_ref[...])      # (Tp, V)

        # one fused mx_proj matmul; result sliced at 128-aligned column offsets
        base = jnp.dot(mx16, mxw_ref[...],
                       preferred_element_type=jnp.float32) + mxb_ref[...]         # (Tp, W)
        u = jax.nn.sigmoid(base[:, 0:D])
        z = _silu(base[:, off_z:off_z + Z])
        r = _silu(base[:, off_r:off_r + V])
        hx = base[:, off_hx:off_hx + D]

        g = gam_ref[...].astype(jnp.float32)
        bt = bet_ref[...].astype(jnp.float32)
        q = (z * g[0:1, :] + bt[0:1, :]) * scaling                # pre-scaled query
        k = z * g[1:2, :] + bt[1:2, :]

        q_out[0] = q.astype(q_out.dtype)
        k_out[0] = k.astype(k_out.dtype)
        v_out[0] = v.astype(v_out.dtype)
        u_out[0] = u.astype(u_out.dtype)
        r_out[0] = r.astype(r_out.dtype)
        hx_out[0] = hx.astype(hx_out.dtype)

    return kernel


# --------------------------------------------------------------------------- #
# Kernel 2: flash attention (online softmax) + h_proj + gated residual + FFN
# --------------------------------------------------------------------------- #
def make_attn_out_kernel(eps=1e-5):
    def kernel(q_ref, k_ref, v_ref, bias_ref, x_ref, u_ref, r_ref, hx_ref,
               hw_ref, hb_ref, fnw_ref, fnb_ref, w1_ref, b1_ref, w2_ref, b2_ref,
               out_ref, m_sc, l_sc, acc_sc):
        kj = pl.program_id(2)

        @pl.when(kj == 0)
        def _():
            m_sc[...] = jnp.full_like(m_sc, -jnp.inf)
            l_sc[...] = jnp.zeros_like(l_sc)
            acc_sc[...] = jnp.zeros_like(acc_sc)

        q = q_ref[0]                                              # (Tq, Z) bf16 (scaled)
        k = k_ref[0]                                              # (Tk, Z) bf16
        s = jax.lax.dot_general(q, k, (((1,), (1,)), ((), ())),
                                preferred_element_type=jnp.float32)   # (Tq, Tk)
        s = s + bias_ref[...].astype(jnp.float32)

        m_prev = m_sc[...]
        m_new = jnp.maximum(m_prev, jnp.max(s, axis=-1, keepdims=True))
        alpha = jnp.exp(m_prev - m_new)
        p = jnp.exp(s - m_new)
        l_sc[...] = alpha * l_sc[...] + jnp.sum(p, axis=-1, keepdims=True)
        acc_sc[...] = alpha * acc_sc[...] + jnp.dot(
            p.astype(v_ref.dtype), v_ref[0], preferred_element_type=jnp.float32)
        m_sc[...] = m_new

        @pl.when(kj == pl.num_programs(2) - 1)
        def _():
            x = x_ref[0].astype(jnp.float32)                      # (Tq, D) residual
            h_att = acc_sc[...] * pl.reciprocal(l_sc[...], approx=True)   # (Tq, V)
            hr = (h_att * r_ref[0].astype(jnp.float32)).astype(jnp.bfloat16)
            # TODO(synk): at production dims on v7x (64 MiB VMEM), tile w1/w2 over H or
            # split h_proj+FFN into a third pallas_call instead of keeping them resident.
            h = _silu(hx_ref[0].astype(jnp.float32)
                      + jnp.dot(hr, hw_ref[...],
                                preferred_element_type=jnp.float32) + hb_ref[...])
            u = u_ref[0].astype(jnp.float32)
            out = x + u * (h - x)                                 # addcmul

            # nffn: prenorm LN -> Linear(D, 2D) -> silu -> Linear(2D, D) + residual
            mu = jnp.mean(out, axis=-1, keepdims=True)
            var = jnp.mean((out - mu) ** 2, axis=-1, keepdims=True)
            yn = (out - mu) * jax.lax.rsqrt(var + eps) * fnw_ref[...] + fnb_ref[...]
            ff = _silu(jnp.dot(yn.astype(jnp.bfloat16), w1_ref[...],
                               preferred_element_type=jnp.float32) + b1_ref[...])
            ff = jnp.dot(ff.astype(jnp.bfloat16), w2_ref[...],
                         preferred_element_type=jnp.float32) + b2_ref[...]
            out_ref[0] = (out + ff).astype(out_ref.dtype)

    return kernel


# --------------------------------------------------------------------------- #
# Host-side glue: EMA (FFT causal conv), rel-pos bias, params, wrapper
# --------------------------------------------------------------------------- #
def ema_fft(xn, delta, alpha, beta_e, gamma_e, omega):
    """Exact causal MultiHeadEMA output via FFT convolution.  xn: (B, L, D) f32."""
    B, L, D = xn.shape
    N = delta.shape[1]
    p = jax.nn.sigmoid(delta)                          # (D, N, 1)
    q = 1.0 - p * jax.nn.sigmoid(alpha)                # (D, N, 1)
    q = jnp.maximum(q, 1e-20)                          # guard 0*log(0) NaN
    t = jnp.arange(L, dtype=jnp.float32).reshape(1, 1, L)
    kern = (p * beta_e) * jnp.exp(t * jnp.log(q))      # (D, N, L)
    scale = math.sqrt(1.0 / N)
    k = jnp.einsum('dnl,dn->dl', kern, gamma_e * scale)            # (D, L)
    nfft = 2 * L
    kf = jnp.fft.rfft(k, n=nfft, axis=-1)                          # (D, .)
    xf = jnp.fft.rfft(jnp.transpose(xn, (0, 2, 1)), n=nfft, axis=-1)   # (B, D, .)
    y = jnp.fft.irfft(xf * kf[None], n=nfft, axis=-1)[..., :L]     # (B, D, L)
    return jnp.transpose(y, (0, 2, 1)) + omega[None, None, :] * xn


def ema_scan_reference(xn, delta, alpha, beta_e, gamma_e, omega):
    """Independent EMA reference via explicit recurrence (lax.scan over L)."""
    B, L, D = xn.shape
    N = delta.shape[1]
    p = jax.nn.sigmoid(delta)[..., 0]                  # (D, N)
    qd = 1.0 - p * jax.nn.sigmoid(alpha)[..., 0]       # (D, N)
    pb = p * beta_e[..., 0]                            # (D, N)
    gam = gamma_e * math.sqrt(1.0 / N)                 # (D, N)

    def step(h, xt):                                   # h: (B, D, N), xt: (B, D)
        h = qd[None] * h + pb[None] * xt[:, :, None]
        yt = jnp.einsum('bdn,dn->bd', h, gam) + omega[None, :] * xt
        return h, yt

    h0 = jnp.zeros((B, D, N), jnp.float32)
    _, ys = jax.lax.scan(step, h0, jnp.transpose(xn, (1, 0, 2)))
    return jnp.transpose(ys, (1, 0, 2))


def simple_rel_pos_bias(rel_pos_param, max_positions, L):
    """Replicates SimpleRelativePositionalBias.forward(seq_len=L) -> (L, L)."""
    b = rel_pos_param[max_positions - L: max_positions + L - 1]    # (2L-1,)
    t = jnp.pad(b, (0, L))                                         # (3L-1,)
    t = jnp.tile(t, L)[:-L]                                        # (3L^2-2L,)
    t = t.reshape(L, 3 * L - 2)
    r = (2 * L - 1) // 2
    return t[:, r:(3 * L - 2) - r]                                 # (L, L)


def init_params(key, D, Z, V, N, max_positions=1024, ff_expand=2):
    ks = jax.random.split(key, 16)
    std = 0.02
    H = ff_expand * D
    val = np.ones((N, 1), np.float32)
    if N > 1:
        val[1::2] = -1.0
    p = dict(
        norm_w=jnp.ones((1, D), jnp.float32),
        norm_b=jnp.zeros((1, D), jnp.float32),
        v_w=std * jax.random.normal(ks[0], (V, D), jnp.float32),
        v_b=jnp.zeros((1, V), jnp.float32),
        mx_w=std * jax.random.normal(ks[1], (Z + V + 2 * D, D), jnp.float32),
        mx_b=jnp.zeros((1, Z + V + 2 * D), jnp.float32),
        h_w=std * jax.random.normal(ks[2], (D, V), jnp.float32),
        h_b=jnp.zeros((1, D), jnp.float32),
        gamma=std * jax.random.normal(ks[3], (2, Z), jnp.float32),
        beta=jnp.zeros((2, Z), jnp.float32),
        rel_pos=std * jax.random.normal(ks[4], (2 * max_positions - 1,), jnp.float32),
        ema_delta=0.2 * jax.random.normal(ks[5], (D, N, 1), jnp.float32),
        ema_alpha=0.2 * jax.random.normal(ks[6], (D, N, 1), jnp.float32),
        ema_beta=jnp.asarray(val)[None, :, :] + 0.02 * jax.random.normal(ks[7], (D, N, 1), jnp.float32),
        ema_gamma=jax.random.normal(ks[8], (D, N), jnp.float32),
        ema_omega=jax.random.normal(ks[9], (D,), jnp.float32),
        ffn_norm_w=jnp.ones((1, D), jnp.float32),
        ffn_norm_b=jnp.zeros((1, D), jnp.float32),
        ff_w1=std * jax.random.normal(ks[10], (H, D), jnp.float32),
        ff_b1=jnp.zeros((1, H), jnp.float32),
        ff_w2=std * jax.random.normal(ks[11], (D, H), jnp.float32),
        ff_b2=jnp.zeros((1, D), jnp.float32),
    )
    return p


def mega_block_forward(x, params, *, d_attin, d_attout, max_positions=1024,
                       t_proj=None, t_q=None, t_k=None):
    B, L, D = x.shape
    Z, V = d_attin, d_attout
    eps = 1e-5

    cfg = _tpu_setup()
    t_proj = cfg['t_proj'] if t_proj is None else t_proj
    t_q = cfg['t_q'] if t_q is None else t_q
    t_k = cfg['t_k'] if t_k is None else t_k
    vmem_limit = cfg['vmem_limit']
    kv_buffers = cfg['kv_buffers']

    # ---- host-side prep (cheap, O(L*D*(N + log L))): LN feeding the EMA, FFT EMA ----
    mu = jnp.mean(x, -1, keepdims=True)
    var = jnp.mean((x - mu) ** 2, -1, keepdims=True)
    xn = (x - mu) * jax.lax.rsqrt(var + eps) * params['norm_w'] + params['norm_b']
    mx_ema = ema_fft(xn, params['ema_delta'], params['ema_alpha'],
                     params['ema_beta'], params['ema_gamma'], params['ema_omega'])
    # TODO(synk): for long L, build the (Tq,Tk) Toeplitz bias tile in-kernel from the
    # (2L-1) rel_pos vector instead of streaming an (L,L) matrix; here it is bf16 only.
    bias_mat = simple_rel_pos_bias(params['rel_pos'], max_positions, L).astype(jnp.bfloat16)

    # ---- weights: bf16 for MXU; mx_proj repacked so u/z/r/hx start at 128-aligned cols ----
    wdt = jnp.bfloat16
    mx_wT = params['mx_w'].T                                    # (D, D+Z+V+D): u|z|r|hx
    Dp, Zp, Vp = _round_up(D, 128), _round_up(Z, 128), _round_up(V, 128)
    off_z, off_r, off_hx = Dp, Dp + Zp, Dp + Zp + Vp
    Wtot = Dp + Zp + Vp + Dp
    mxw = jnp.zeros((D, Wtot), jnp.float32)
    mxb = jnp.zeros((1, Wtot), jnp.float32)
    mxw = mxw.at[:, 0:D].set(mx_wT[:, 0:D])
    mxw = mxw.at[:, off_z:off_z + Z].set(mx_wT[:, D:D + Z])
    mxw = mxw.at[:, off_r:off_r + V].set(mx_wT[:, D + Z:D + Z + V])
    mxw = mxw.at[:, off_hx:off_hx + D].set(mx_wT[:, D + Z + V:])
    mxb = mxb.at[:, 0:D].set(params['mx_b'][:, 0:D])
    mxb = mxb.at[:, off_z:off_z + Z].set(params['mx_b'][:, D:D + Z])
    mxb = mxb.at[:, off_r:off_r + V].set(params['mx_b'][:, D + Z:D + Z + V])
    mxb = mxb.at[:, off_hx:off_hx + D].set(params['mx_b'][:, D + Z + V:])
    mxw = mxw.astype(wdt)

    vw = params['v_w'].T.astype(wdt)
    hw = params['h_w'].T.astype(wdt)
    w1 = params['ff_w1'].T.astype(wdt)
    w2 = params['ff_w2'].T.astype(wdt)
    xn16 = xn.astype(wdt)
    mx_ema16 = mx_ema.astype(wdt)                               # bf16 stream into kernel 1

    # ---------------- kernel 1: projections ----------------
    Tp = min(t_proj, L)
    assert L % Tp == 0, "sequence length must be divisible by the projection tile"
    nL = L // Tp
    seq_spec_D = pl.BlockSpec((1, Tp, D), lambda b, i: (b, i, 0))

    q, k, v, u, r, hx = pl.pallas_call(
        make_proj_kernel(Z ** (-0.5), D, Z, V, off_z, off_r, off_hx),
        out_shape=(
            jax.ShapeDtypeStruct((B, L, Z), jnp.bfloat16),   # q (pre-scaled)
            jax.ShapeDtypeStruct((B, L, Z), jnp.bfloat16),   # k
            jax.ShapeDtypeStruct((B, L, V), jnp.bfloat16),   # v
            jax.ShapeDtypeStruct((B, L, D), jnp.bfloat16),   # u (gate)   bf16 stream
            jax.ShapeDtypeStruct((B, L, V), jnp.bfloat16),   # r
            jax.ShapeDtypeStruct((B, L, D), jnp.bfloat16),   # hx         bf16 stream
        ),
        grid_spec=pltpu.PrefetchScalarGridSpec(
            num_scalar_prefetch=0,
            grid=(B, nL),
            in_specs=[
                seq_spec_D,                         # xn (bf16)
                seq_spec_D,                         # mx_ema (bf16)
                _bcast_spec(vw.shape), _bcast_spec(params['v_b'].shape),
                _bcast_spec(mxw.shape), _bcast_spec(mxb.shape),
                _bcast_spec(params['gamma'].shape), _bcast_spec(params['beta'].shape),
            ],
            out_specs=[
                pl.BlockSpec((1, Tp, Z), lambda b, i: (b, i, 0)),
                pl.BlockSpec((1, Tp, Z), lambda b, i: (b, i, 0)),
                pl.BlockSpec((1, Tp, V), lambda b, i: (b, i, 0)),
                pl.BlockSpec((1, Tp, D), lambda b, i: (b, i, 0)),
                pl.BlockSpec((1, Tp, V), lambda b, i: (b, i, 0)),
                pl.BlockSpec((1, Tp, D), lambda b, i: (b, i, 0)),
            ],
        ),
        compiler_params=pltpu.CompilerParams(
            dimension_semantics=("parallel", "parallel"),
            vmem_limit_bytes=vmem_limit),
    )(xn16, mx_ema16, vw, params['v_b'], mxw, mxb, params['gamma'], params['beta'])

    # ------- kernel 2: flash attention + h_proj + gated residual + FFN -------
    Tq, Tk = min(t_q, L), min(t_k, L)
    assert L % Tq == 0 and L % Tk == 0, "sequence length must divide the attention tiles"
    nQ, nK = L // Tq, L // Tk

    # k/v streams: deeper prefetch only where HBM BW is the limiter (v5e)
    k_spec = _spec((1, Tk, Z), lambda b, qi, kj: (b, kj, 0), buffers=kv_buffers)
    v_spec = _spec((1, Tk, V), lambda b, qi, kj: (b, kj, 0), buffers=kv_buffers)

    out = pl.pallas_call(
        make_attn_out_kernel(eps=eps),
        out_shape=jax.ShapeDtypeStruct((B, L, D), x.dtype),
        grid_spec=pltpu.PrefetchScalarGridSpec(
            num_scalar_prefetch=0,
            grid=(B, nQ, nK),                      # B*nQ >= 2 keeps both v7x TCs busy
            in_specs=[
                pl.BlockSpec((1, Tq, Z), lambda b, qi, kj: (b, qi, 0)),   # q
                k_spec,                                                   # k
                v_spec,                                                   # v
                pl.BlockSpec((Tq, Tk), lambda b, qi, kj: (qi, kj)),       # rel-pos bias bf16
                pl.BlockSpec((1, Tq, D), lambda b, qi, kj: (b, qi, 0)),   # x (residual)
                pl.BlockSpec((1, Tq, D), lambda b, qi, kj: (b, qi, 0)),   # u
                pl.BlockSpec((1, Tq, V), lambda b, qi, kj: (b, qi, 0)),   # r
                pl.BlockSpec((1, Tq, D), lambda b, qi, kj: (b, qi, 0)),   # hx
                _bcast_spec(hw.shape), _bcast_spec(params['h_b'].shape),
                _bcast_spec(params['ffn_norm_w'].shape),
                _bcast_spec(params['ffn_norm_b'].shape),
                _bcast_spec(w1.shape), _bcast_spec(params['ff_b1'].shape),
                _bcast_spec(w2.shape), _bcast_spec(params['ff_b2'].shape),
            ],
            out_specs=pl.BlockSpec((1, Tq, D), lambda b, qi, kj: (b, qi, 0)),
            scratch_shapes=[
                pltpu.VMEM((Tq, 1), jnp.float32),    # running max
                pltpu.VMEM((Tq, 1), jnp.float32),    # running denom
                pltpu.VMEM((Tq, V), jnp.float32),    # output accumulator
            ],
        ),
        compiler_params=pltpu.CompilerParams(
            dimension_semantics=("parallel", "parallel", "arbitrary"),
            vmem_limit_bytes=vmem_limit),
    )(q, k, v, bias_mat, x, u, r, hx, hw, params['h_b'],
      params['ffn_norm_w'], params['ffn_norm_b'],
      w1, params['ff_b1'], w2, params['ff_b2'])
    return out


# --------------------------------------------------------------------------- #
# Pure-JAX f32 reference (independent EMA via scan) for a sanity check
# --------------------------------------------------------------------------- #
def mega_reference(x, params, *, d_attin, d_attout, max_positions=1024):
    B, L, D = x.shape
    Z, V = d_attin, d_attout

    def ln(y, w, b):
        mu = jnp.mean(y, -1, keepdims=True)
        var = jnp.mean((y - mu) ** 2, -1, keepdims=True)
        return (y - mu) * jax.lax.rsqrt(var + 1e-5) * w + b

    bias_mat = simple_rel_pos_bias(params['rel_pos'], max_positions, L)
    xn = ln(x, params['norm_w'], params['norm_b'])
    v = _silu(xn @ params['v_w'].T + params['v_b'])
    mx = _silu(ema_scan_reference(xn, params['ema_delta'], params['ema_alpha'],
                                  params['ema_beta'], params['ema_gamma'],
                                  params['ema_omega']))
    base = mx @ params['mx_w'].T + params['mx_b']
    u = jax.nn.sigmoid(base[..., :D])
    zr = _silu(base[..., D:D + Z + V])
    hx = base[..., D + Z + V:]
    z, r = zr[..., :Z], zr[..., Z:]
    q = z * params['gamma'][0] + params['beta'][0]
    k = z * params['gamma'][1] + params['beta'][1]
    qk = jnp.einsum('blz,bmz->blm', q * (Z ** -0.5), k) + bias_mat
    attn = jax.nn.softmax(qk, axis=-1)
    h = jnp.einsum('blm,bmv->blv', attn, v)
    h = _silu(hx + (h * r) @ params['h_w'].T + params['h_b'])
    out = x + u * (h - x)
    yn = ln(out, params['ffn_norm_w'], params['ffn_norm_b'])
    ff = _silu(yn @ params['ff_w1'].T + params['ff_b1']) @ params['ff_w2'].T + params['ff_b2']
    return out + ff


if __name__ == "__main__":
    B, L, D = 2, 64, 32           # batch, seq, d_model (small test shapes)
    Z, V, N = 16, 32, 4           # d_attin, d_attout, d_state
    MAXP = 1024

    key = jax.random.PRNGKey(0)
    kx, kp = jax.random.split(key)
    x = jax.random.normal(kx, (B, L, D), jnp.float32)
    params = init_params(kp, D, Z, V, N, max_positions=MAXP)

    out = mega_block_forward(x, params, d_attin=Z, d_attout=V, max_positions=MAXP)
    out = jax.block_until_ready(out)

    ref = jax.block_until_ready(
        mega_reference(x, params, d_attin=Z, d_attout=V, max_positions=MAXP))

    assert out.shape == (B, L, D)
    assert bool(jnp.all(jnp.isfinite(out)))
    np.testing.assert_allclose(np.asarray(out), np.asarray(ref), rtol=2e-2, atol=2e-2)
    print("KERNEL_OK")
</pallas_src>

<mosaic_0001>
module attributes {stable_mosaic.version = 11 : i64} {
  func.func @kernel(%arg0: i32, %arg1: i32, %arg2: memref<1x64x32xbf16, #tpu.memory_space<vmem>>, %arg3: memref<1x64x32xbf16, #tpu.memory_space<vmem>>, %arg4: memref<32x32xbf16, #tpu.memory_space<vmem>>, %arg5: memref<1x32xf32, #tpu.memory_space<vmem>>, %arg6: memref<32x512xbf16, #tpu.memory_space<vmem>>, %arg7: memref<1x512xf32, #tpu.memory_space<vmem>>, %arg8: memref<2x16xf32, #tpu.memory_space<vmem>>, %arg9: memref<2x16xf32, #tpu.memory_space<vmem>>, %arg10: memref<1x64x16xbf16, #tpu.memory_space<vmem>>, %arg11: memref<1x64x16xbf16, #tpu.memory_space<vmem>>, %arg12: memref<1x64x32xbf16, #tpu.memory_space<vmem>>, %arg13: memref<1x64x32xbf16, #tpu.memory_space<vmem>>, %arg14: memref<1x64x32xbf16, #tpu.memory_space<vmem>>, %arg15: memref<1x64x32xbf16, #tpu.memory_space<vmem>>) attributes {dimension_semantics = [#tpu.dimension_semantics<parallel>, #tpu.dimension_semantics<parallel>], iteration_bounds = array<i64: 2, 1>, scalar_prefetch = 0 : i64, scratch_operands = 0 : i64, tpu.core_type = #tpu.core_type<tc>, window_params = [{transform_indices = @transform_0, window_bounds = array<i64: 1, 64, 32>}, {transform_indices = @transform_1, window_bounds = array<i64: 1, 64, 32>}, {pipeline_mode = #tpu.pipeline_mode<synchronous>, transform_indices = @transform_2, window_bounds = array<i64: 32, 32>}, {pipeline_mode = #tpu.pipeline_mode<synchronous>, transform_indices = @transform_3, window_bounds = array<i64: 1, 32>}, {pipeline_mode = #tpu.pipeline_mode<synchronous>, transform_indices = @transform_4, window_bounds = array<i64: 32, 512>}, {pipeline_mode = #tpu.pipeline_mode<synchronous>, transform_indices = @transform_5, window_bounds = array<i64: 1, 512>}, {pipeline_mode = #tpu.pipeline_mode<synchronous>, transform_indices = @transform_6, window_bounds = array<i64: 2, 16>}, {pipeline_mode = #tpu.pipeline_mode<synchronous>, transform_indices = @transform_7, window_bounds = array<i64: 2, 16>}, {transform_indices = @transform_8, window_bounds = array<i64: 1, 64, 16>}, {transform_indices = @transform_9, window_bounds = array<i64: 1, 64, 16>}, {transform_indices = @transform_10, window_bounds = array<i64: 1, 64, 32>}, {transform_indices = @transform_11, window_bounds = array<i64: 1, 64, 32>}, {transform_indices = @transform_12, window_bounds = array<i64: 1, 64, 32>}, {transform_indices = @transform_13, window_bounds = array<i64: 1, 64, 32>}]} {
    %c0 = arith.constant 0 : index
    %c0_0 = arith.constant 0 : index
    %c0_1 = arith.constant 0 : index
    %0 = vector.load %arg2[%c0, %c0_0, %c0_1] : memref<1x64x32xbf16, #tpu.memory_space<vmem>>, vector<1x64x32xbf16>
    %1 = vector.shape_cast %0 : vector<1x64x32xbf16> to vector<64x32xbf16>
    %c0_2 = arith.constant 0 : index
    %c0_3 = arith.constant 0 : index
    %c0_4 = arith.constant 0 : index
    %2 = vector.load %arg3[%c0_2, %c0_3, %c0_4] : memref<1x64x32xbf16, #tpu.memory_space<vmem>>, vector<1x64x32xbf16>
    %3 = vector.shape_cast %2 : vector<1x64x32xbf16> to vector<64x32xbf16>
    %4 = arith.extf %3 : vector<64x32xbf16> to vector<64x32xf32>
    %5 = arith.negf %4 : vector<64x32xf32>
    %6 = math.exp %5 : vector<64x32xf32>
    %cst = arith.constant 1.000000e+00 : f32
    %7 = vector.broadcast %cst : f32 to vector<64x32xf32>
    %8 = arith.addf %7, %6 : vector<64x32xf32>
    %9 = arith.divf %7, %8 : vector<64x32xf32>
    %10 = arith.mulf %4, %9 : vector<64x32xf32>
    %11 = arith.truncf %10 : vector<64x32xf32> to vector<64x32xbf16>
    %c0_5 = arith.constant 0 : index
    %c0_6 = arith.constant 0 : index
    %12 = vector.load %arg4[%c0_5, %c0_6] : memref<32x32xbf16, #tpu.memory_space<vmem>>, vector<32x32xbf16>
    %cst_7 = arith.constant dense<0.000000e+00> : vector<64x32xf32>
    %13 = tpu.matmul %1, %12, %cst_7 {dimension_numbers = #tpu.dot_dimension_numbers<[1], [0], [0], [1], [0, 0, 1, 1], [], []>} : vector<64x32xbf16>, vector<32x32xbf16>, vector<64x32xf32> -> vector<64x32xf32>
    %c0_8 = arith.constant 0 : index
    %c0_9 = arith.constant 0 : index
    %14 = vector.load %arg5[%c0_8, %c0_9] : memref<1x32xf32, #tpu.memory_space<vmem>>, vector<1x32xf32>
    %15 = vector.broadcast %14 : vector<1x32xf32> to vector<64x32xf32>
    %16 = arith.addf %13, %15 : vector<64x32xf32>
    %17 = arith.negf %16 : vector<64x32xf32>
    %18 = math.exp %17 : vector<64x32xf32>
    %cst_10 = arith.constant 1.000000e+00 : f32
    %19 = vector.broadcast %cst_10 : f32 to vector<64x32xf32>
    %20 = arith.addf %19, %18 : vector<64x32xf32>
    %21 = arith.divf %19, %20 : vector<64x32xf32>
    %22 = arith.mulf %16, %21 : vector<64x32xf32>
    %c0_11 = arith.constant 0 : index
    %c0_12 = arith.constant 0 : index
    %23 = vector.load %arg6[%c0_11, %c0_12] : memref<32x512xbf16, #tpu.memory_space<vmem>>, vector<32x512xbf16>
    %cst_13 = arith.constant dense<0.000000e+00> : vector<64x512xf32>
    %24 = tpu.matmul %11, %23, %cst_13 {dimension_numbers = #tpu.dot_dimension_numbers<[1], [0], [0], [1], [0, 0, 1, 1], [], []>} : vector<64x32xbf16>, vector<32x512xbf16>, vector<64x512xf32> -> vector<64x512xf32>
    %c0_14 = arith.constant 0 : index
    %c0_15 = arith.constant 0 : index
    %25 = vector.load %arg7[%c0_14, %c0_15] : memref<1x512xf32, #tpu.memory_space<vmem>>, vector<1x512xf32>
    %26 = vector.broadcast %25 : vector<1x512xf32> to vector<64x512xf32>
    %27 = arith.addf %24, %26 : vector<64x512xf32>
    %28 = vector.extract_strided_slice %27 {offsets = [0, 0], sizes = [64, 32], strides = [1, 1]} : vector<64x512xf32> to vector<64x32xf32>
    %29 = arith.negf %28 : vector<64x32xf32>
    %30 = math.exp %29 : vector<64x32xf32>
    %cst_16 = arith.constant 1.000000e+00 : f32
    %31 = vector.broadcast %cst_16 : f32 to vector<64x32xf32>
    %32 = arith.addf %31, %30 : vector<64x32xf32>
    %33 = arith.divf %31, %32 : vector<64x32xf32>
    %34 = vector.extract_strided_slice %27 {offsets = [0, 128], sizes = [64, 16], strides = [1, 1]} : vector<64x512xf32> to vector<64x16xf32>
    %35 = arith.negf %34 : vector<64x16xf32>
    %36 = math.exp %35 : vector<64x16xf32>
    %cst_17 = arith.constant 1.000000e+00 : f32
    %37 = vector.broadcast %cst_17 : f32 to vector<64x16xf32>
    %38 = arith.addf %37, %36 : vector<64x16xf32>
    %39 = arith.divf %37, %38 : vector<64x16xf32>
    %40 = arith.mulf %34, %39 : vector<64x16xf32>
    %41 = vector.extract_strided_slice %27 {offsets = [0, 256], sizes = [64, 32], strides = [1, 1]} : vector<64x512xf32> to vector<64x32xf32>
    %42 = arith.negf %41 : vector<64x32xf32>
    %43 = math.exp %42 : vector<64x32xf32>
    %cst_18 = arith.constant 1.000000e+00 : f32
    %44 = vector.broadcast %cst_18 : f32 to vector<64x32xf32>
    %45 = arith.addf %44, %43 : vector<64x32xf32>
    %46 = arith.divf %44, %45 : vector<64x32xf32>
    %47 = arith.mulf %41, %46 : vector<64x32xf32>
    %48 = vector.extract_strided_slice %27 {offsets = [0, 384], sizes = [64, 32], strides = [1, 1]} : vector<64x512xf32> to vector<64x32xf32>
    %c0_19 = arith.constant 0 : index
    %c0_20 = arith.constant 0 : index
    %49 = vector.load %arg8[%c0_19, %c0_20] : memref<2x16xf32, #tpu.memory_space<vmem>>, vector<2x16xf32>
    %c0_21 = arith.constant 0 : index
    %c0_22 = arith.constant 0 : index
    %50 = vector.load %arg9[%c0_21, %c0_22] : memref<2x16xf32, #tpu.memory_space<vmem>>, vector<2x16xf32>
    %51 = vector.extract_strided_slice %49 {offsets = [0, 0], sizes = [1, 16], strides = [1, 1]} : vector<2x16xf32> to vector<1x16xf32>
    %52 = vector.broadcast %51 : vector<1x16xf32> to vector<64x16xf32>
    %53 = arith.mulf %40, %52 : vector<64x16xf32>
    %54 = vector.extract_strided_slice %50 {offsets = [0, 0], sizes = [1, 16], strides = [1, 1]} : vector<2x16xf32> to vector<1x16xf32>
    %55 = vector.broadcast %54 : vector<1x16xf32> to vector<64x16xf32>
    %56 = arith.addf %53, %55 : vector<64x16xf32>
    %cst_23 = arith.constant 2.500000e-01 : f32
    %57 = vector.broadcast %cst_23 : f32 to vector<64x16xf32>
    %58 = arith.mulf %56, %57 : vector<64x16xf32>
    %59 = vector.extract_strided_slice %49 {offsets = [1, 0], sizes = [1, 16], strides = [1, 1]} : vector<2x16xf32> to vector<1x16xf32>
    %60 = vector.broadcast %59 : vector<1x16xf32> to vector<64x16xf32>
    %61 = arith.mulf %40, %60 : vector<64x16xf32>
    %62 = vector.extract_strided_slice %50 {offsets = [1, 0], sizes = [1, 16], strides = [1, 1]} : vector<2x16xf32> to vector<1x16xf32>
    %63 = vector.broadcast %62 : vector<1x16xf32> to vector<64x16xf32>
    %64 = arith.addf %61, %63 : vector<64x16xf32>
    %65 = arith.truncf %58 : vector<64x16xf32> to vector<64x16xbf16>
    %c0_24 = arith.constant 0 : index
    %c0_25 = arith.constant 0 : index
    %c0_26 = arith.constant 0 : index
    %66 = vector.load %arg10[%c0_24, %c0_25, %c0_26] : memref<1x64x16xbf16, #tpu.memory_space<vmem>>, vector<1x64x16xbf16>
    %67 = vector.shape_cast %66 : vector<1x64x16xbf16> to vector<64x16xbf16>
    %68 = vector.shape_cast %65 : vector<64x16xbf16> to vector<1x64x16xbf16>
    tpu.vector_store %arg10[%c0_24, %c0_25, %c0_26], %68 {strides = array<i32>} : memref<1x64x16xbf16, #tpu.memory_space<vmem>>, vector<1x64x16xbf16>,
    %69 = arith.truncf %64 : vector<64x16xf32> to vector<64x16xbf16>
    %c0_27 = arith.constant 0 : index
    %c0_28 = arith.constant 0 : index
    %c0_29 = arith.constant 0 : index
    %70 = vector.load %arg11[%c0_27, %c0_28, %c0_29] : memref<1x64x16xbf16, #tpu.memory_space<vmem>>, vector<1x64x16xbf16>
    %71 = vector.shape_cast %70 : vector<1x64x16xbf16> to vector<64x16xbf16>
    %72 = vector.shape_cast %69 : vector<64x16xbf16> to vector<1x64x16xbf16>
    tpu.vector_store %arg11[%c0_27, %c0_28, %c0_29], %72 {strides = array<i32>} : memref<1x64x16xbf16, #tpu.memory_space<vmem>>, vector<1x64x16xbf16>,
    %73 = arith.truncf %22 : vector<64x32xf32> to vector<64x32xbf16>
    %c0_30 = arith.constant 0 : index
    %c0_31 = arith.constant 0 : index
    %c0_32 = arith.constant 0 : index
    %74 = vector.load %arg12[%c0_30, %c0_31, %c0_32] : memref<1x64x32xbf16, #tpu.memory_space<vmem>>, vector<1x64x32xbf16>
    %75 = vector.shape_cast %74 : vector<1x64x32xbf16> to vector<64x32xbf16>
    %76 = vector.shape_cast %73 : vector<64x32xbf16> to vector<1x64x32xbf16>
    tpu.vector_store %arg12[%c0_30, %c0_31, %c0_32], %76 {strides = array<i32>} : memref<1x64x32xbf16, #tpu.memory_space<vmem>>, vector<1x64x32xbf16>,
    %77 = arith.truncf %33 : vector<64x32xf32> to vector<64x32xbf16>
    %c0_33 = arith.constant 0 : index
    %c0_34 = arith.constant 0 : index
    %c0_35 = arith.constant 0 : index
    %78 = vector.load %arg13[%c0_33, %c0_34, %c0_35] : memref<1x64x32xbf16, #tpu.memory_space<vmem>>, vector<1x64x32xbf16>
    %79 = vector.shape_cast %78 : vector<1x64x32xbf16> to vector<64x32xbf16>
    %80 = vector.shape_cast %77 : vector<64x32xbf16> to vector<1x64x32xbf16>
    tpu.vector_store %arg13[%c0_33, %c0_34, %c0_35], %80 {strides = array<i32>} : memref<1x64x32xbf16, #tpu.memory_space<vmem>>, vector<1x64x32xbf16>,
    %81 = arith.truncf %47 : vector<64x32xf32> to vector<64x32xbf16>
    %c0_36 = arith.constant 0 : index
    %c0_37 = arith.constant 0 : index
    %c0_38 = arith.constant 0 : index
    %82 = vector.load %arg14[%c0_36, %c0_37, %c0_38] : memref<1x64x32xbf16, #tpu.memory_space<vmem>>, vector<1x64x32xbf16>
    %83 = vector.shape_cast %82 : vector<1x64x32xbf16> to vector<64x32xbf16>
    %84 = vector.shape_cast %81 : vector<64x32xbf16> to vector<1x64x32xbf16>
    tpu.vector_store %arg14[%c0_36, %c0_37, %c0_38], %84 {strides = array<i32>} : memref<1x64x32xbf16, #tpu.memory_space<vmem>>, vector<1x64x32xbf16>,
    %85 = arith.truncf %48 : vector<64x32xf32> to vector<64x32xbf16>
    %c0_39 = arith.constant 0 : index
    %c0_40 = arith.constant 0 : index
    %c0_41 = arith.constant 0 : index
    %86 = vector.load %arg15[%c0_39, %c0_40, %c0_41] : memref<1x64x32xbf16, #tpu.memory_space<vmem>>, vector<1x64x32xbf16>
    %87 = vector.shape_cast %86 : vector<1x64x32xbf16> to vector<64x32xbf16>
    %88 = vector.shape_cast %85 : vector<64x32xbf16> to vector<1x64x32xbf16>
    tpu.vector_store %arg15[%c0_39, %c0_40, %c0_41], %88 {strides = array<i32>} : memref<1x64x32xbf16, #tpu.memory_space<vmem>>, vector<1x64x32xbf16>,
    return
  }
  func.func @transform_0(%arg0: i32, %arg1: i32) -> (i32, i32, i32) {
    %c0_i32 = arith.constant 0 : i32
    %c0_i32_0 = arith.constant 0 : i32
    return %arg0, %arg1, %c0_i32 : i32, i32, i32
  }
  func.func @transform_1(%arg0: i32, %arg1: i32) -> (i32, i32, i32) {
    %c0_i32 = arith.constant 0 : i32
    %c0_i32_0 = arith.constant 0 : i32
    return %arg0, %arg1, %c0_i32 : i32, i32, i32
  }
  func.func @transform_2(%arg0: i32, %arg1: i32) -> (i32, i32) {
    %c0_i32 = arith.constant 0 : i32
    %c0_i32_0 = arith.constant 0 : i32
    %c0_i32_1 = arith.constant 0 : i32
    return %c0_i32, %c0_i32_0 : i32, i32
  }
  func.func @transform_3(%arg0: i32, %arg1: i32) -> (i32, i32) {
    %c0_i32 = arith.constant 0 : i32
    %c0_i32_0 = arith.constant 0 : i32
    %c0_i32_1 = arith.constant 0 : i32
    return %c0_i32, %c0_i32_0 : i32, i32
  }
  func.func @transform_4(%arg0: i32, %arg1: i32) -> (i32, i32) {
    %c0_i32 = arith.constant 0 : i32
    %c0_i32_0 = arith.constant 0 : i32
    %c0_i32_1 = arith.constant 0 : i32
    return %c0_i32, %c0_i32_0 : i32, i32
  }
  func.func @transform_5(%arg0: i32, %arg1: i32) -> (i32, i32) {
    %c0_i32 = arith.constant 0 : i32
    %c0_i32_0 = arith.constant 0 : i32
    %c0_i32_1 = arith.constant 0 : i32
    return %c0_i32, %c0_i32_0 : i32, i32
  }
  func.func @transform_6(%arg0: i32, %arg1: i32) -> (i32, i32) {
    %c0_i32 = arith.constant 0 : i32
    %c0_i32_0 = arith.constant 0 : i32
    %c0_i32_1 = arith.constant 0 : i32
    return %c0_i32, %c0_i32_0 : i32, i32
  }
  func.func @transform_7(%arg0: i32, %arg1: i32) -> (i32, i32) {
    %c0_i32 = arith.constant 0 : i32
    %c0_i32_0 = arith.constant 0 : i32
    %c0_i32_1 = arith.constant 0 : i32
    return %c0_i32, %c0_i32_0 : i32, i32
  }
  func.func @transform_8(%arg0: i32, %arg1: i32) -> (i32, i32, i32) {
    %c0_i32 = arith.constant 0 : i32
    %c0_i32_0 = arith.constant 0 : i32
    return %arg0, %arg1, %c0_i32 : i32, i32, i32
  }
  func.func @transform_9(%arg0: i32, %arg1: i32) -> (i32, i32, i32) {
    %c0_i32 = arith.constant 0 : i32
    %c0_i32_0 = arith.constant 0 : i32
    return %arg0, %arg1, %c0_i32 : i32, i32, i32
  }
  func.func @transform_10(%arg0: i32, %arg1: i32) -> (i32, i32, i32) {
    %c0_i32 = arith.constant 0 : i32
    %c0_i32_0 = arith.constant 0 : i32
    return %arg0, %arg1, %c0_i32 : i32, i32, i32
  }
  func.func @transform_11(%arg0: i32, %arg1: i32) -> (i32, i32, i32) {
    %c0_i32 = arith.constant 0 : i32
    %c0_i32_0 = arith.constant 0 : i32
    return %arg0, %arg1, %c0_i32 : i32, i32, i32
  }
  func.func @transform_12(%arg0: i32, %arg1: i32) -> (i32, i32, i32) {
    %c0_i32 = arith.constant 0 : i32
    %c0_i32_0 = arith.constant 0 : i32
    return %arg0, %arg1, %c0_i32 : i32, i32, i32
  }
  func.func @transform_13(%arg0: i32, %arg1: i32) -> (i32, i32, i32) {
    %c0_i32 = arith.constant 0 : i32
    %c0_i32_0 = arith.constant 0 : i32
    return %arg0, %arg1, %c0_i32 : i32, i32, i32
  }
}

</mosaic_0001>

<bundles_post_ra>
// kernel: tpu_custom_call.1
= control target key start
LH: loop header
LB: loop body
LE: loop exit
PB: predicated region body
PF: predicated region fallthrough
CT: control target
= control target key end

     0   :  { %s2470_s25 = smov 0   ;;  %s2472_s26 = smov 0   ;;  %s2900_s0 = inlined_call_operand.vmem [shape: bf16[2,64,32], index: 0, kind: input, shape index: {}]   ;;  %s2901_s1 = inlined_call_operand.vmem [shape: bf16[2,64,32], index: 1, kind: input, shape index: {}]   ;;  %s2902_s2 = inlined_call_operand.vmem [shape: bf16[32,32], index: 2, kind: input, shape index: {}]   ;;  %s2903_s3 = inlined_call_operand.vmem [shape: f32[1,32], index: 3, kind: input, shape index: {}]   ;;  %s2904_s4 = inlined_call_operand.vmem [shape: bf16[32,512], index: 4, kind: input, shape index: {}]   ;;  %s2905_s5 = inlined_call_operand.vmem [shape: f32[1,512], index: 5, kind: input, shape index: {}]   ;;  %s2906_s6 = inlined_call_operand.vmem [shape: f32[2,16], index: 6, kind: input, shape index: {}]   ;;  %s2907_s7 = inlined_call_operand.vmem [shape: f32[2,16], index: 7, kind: input, shape index: {}]   ;;  %s2908_s8 = inlined_call_operand.vmem [shape: bf16[2,64,16], index: 8, kind: output, shape index: {0}]   ;;  %s2909_s9 = inlined_call_operand.vmem [shape: bf16[2,64,16], index: 9, kind: output, shape index: {1}]   ;;  %s2910_s10 = inlined_call_operand.vmem [shape: bf16[2,64,32], index: 10, kind: output, shape index: {2}]   ;;  %s2911_s11 = inlined_call_operand.vmem [shape: bf16[2,64,32], index: 11, kind: output, shape index: {3}]   ;;  %s2912_s12 = inlined_call_operand.vmem [shape: bf16[2,64,32], index: 12, kind: output, shape index: {4}]   ;;  %s2913_s13 = inlined_call_operand.vmem [shape: bf16[2,64,32], index: 13, kind: output, shape index: {5}]  }
   0x1   :  { %s2474_s27 = smov 0  }
   0x2 LB: > { %s36_s28 = sadd.s32 1, %s2393_s26  ;;  %p1941_p0 = scmp.ge.s32.totalorder %s2397_s27, 1  ;;  %s2397_s27 = sphi %s2474_s27, %s24_s27   ;;  %s2393_s26 = sphi %s2472_s26, %s2915_s26   ;;  %s2389_s25 = sphi %s2470_s25, %s2914_s25  }
   0x3   : > { %p38_p1 = scmp.ge.s32.totalorder %s36_s28, 2  ;;  %p446_p2 = scmp.lt.s32.totalorder %s2397_s27, 3 }
   0x5   : > { %s2917_s28 = smov (%p38_p1, %s36_s28), 0  ;;  %p447_p3 = pnand %p1941_p0, %p446_p2 }
   0x6   : > { %p553_p4 = scmp.lt.s32.totalorder (!%p447_p3), %s2389_s25, 1 }
   0x7   : > { %450 = sbr.rel (%p447_p3) target bundleno = 351 (0x15f), region = 52 }
   0xc   : > { %v2197_v0 = vld [vmem:[%s2902_s2 + $0x8] sm:$0xff]   ;;  %v2198_v1 = vld [vmem:[%s2902_s2] sm:$0xff]   ;;  %s2919_s25 = smov (!%p553_p4, %s2389_s25), 1  ;;  %vm760_vm0 = vcmask 261120   ;;  %v2399_v16 = vmov 0   ;;  %vm1453_vm1 = vcmask 257024  }
   0xd   : > { %2156 = vmatprep.subr.bf16.mxu0 %v2197_v0  ;;  %2168 = vmatprep.subr.bf16.mxu1 %v2197_v0  ;;  %s2494_s16 = sshll.u32 %s2919_s25, 5  ;;  %v2205_v2 = vld [vmem:[%s2904_s4 + $0x24] ss:$16 sps:$4 sm:$0xff]   ;;  %v2206_v3 = vld [vmem:[%s2904_s4 + $0x28] ss:$16 sps:$4 sm:$0xff]   ;;  %vm1372_vm2 = vcmask 125952  }
   0xe   : > { %2157 = vmatpush3.bf16.msra.mxu0 %v2197_v0  ;;  %2170 = vmatpush3.bf16.msra.mxu1 %v2197_v0  ;;  %s560_s21 = scalar_lea.vmem %s2900_s0, %s2494_s16  ;;  %v2208_v4 = vld [vmem:[%s2904_s4 + $0x2c] ss:$16 sps:$4 sm:$0xff]   ;;  %v2203_v6 = vld [vmem:[%s2904_s4 + $0x20] ss:$16 sps:$4 sm:$0xff]   ;;  %v2211_v8 = vld [vmem:[%s2904_s4 + $0x4] ss:$16 sps:$4 sm:$0xff]   ;;  %s2520_s19 = scalar_lea.vmem %s2901_s1, %s2494_s16 }
   0xf   : > { %2158 = vmatprep.subr.bf16.mxu0 %v2198_v1  ;;  %2169 = vmatprep.subr.bf16.mxu1 %v2198_v1  ;;  %v2199_v5 = vld [vmem:[%s560_s21] sm:$0xff]   ;;  %v2200_v7 = vld [vmem:[%s560_s21 + $0x10] sm:$0xff]   ;;  %v2201_v9 = vld [vmem:[%s560_s21 + $0x8] sm:$0xff]   ;;  %s2646_s23 = scalar_lea.vmem %s2913_s13, %s2494_s16  ;;  %s2732_s15 = scalar_lea.vmem %s2911_s11, %s2494_s16 }
  0x10   : > { %2160 = vmatprep.mubr.msk.bf16.mxu0 %vm760_vm0, %v2199_v5  ;;  %2164 = vmatprep.mubr.msk.bf16.mxu1 %vm760_vm0, %v2200_v7  ;;  %v2202_v10 = vld [vmem:[%s560_s21 + $0x18] sm:$0xff]   ;;  %v2532_v13 = vld [vmem:[%s2520_s19] sm:$0xff]   ;;  %v2535_v14 = vld [vmem:[%s2520_s19 + $0x8] sm:$0xff]   ;;  %s2788_s29 = scalar_lea.vmem %s2908_s8, %s2494_s16 }
  0x11   : > { %v2212_v11 = vld [vmem:[%s2904_s4 + $0x8] ss:$16 sps:$4 sm:$0xff]   ;;  %v2214_v12 = vld [vmem:[%s2904_s4 + $0xc] ss:$16 sps:$4 sm:$0xff]   ;;  %v2209_v15 = vld [vmem:[%s2904_s4] ss:$16 sps:$4 sm:$0xff]   ;;  %v2133_v17 = vunpack.c.l.bf16 %v2532_v13  ;;  %v2134_v18 = vunpack.c.h.bf16 %v2532_v13  ;;  %v2137_v19 = vunpack.c.l.bf16 %v2535_v14  ;;  %v2138_v20 = vunpack.c.h.bf16 %v2535_v14 }
  0x12   : > { %2159 = vmatpush3.bf16.msra.mxu0 %v2198_v1  ;;  %2171 = vmatpush3.bf16.msra.mxu1 %v2198_v1  ;;  %v2546_v21 = vld [vmem:[%s2520_s19 + $0x10] sm:$0xff]   ;;  %v2149_v30 = vld [vmem:[%s2520_s19 + $0x18] sm:$0xff]   ;;  %v1966_v7 = vld [vmem:[%s2903_s3] ss:$0 sm:$0xff]  ;;  %s2598_s19 = scalar_lea.vmem %s2910_s10, %s2494_s16 }
  0x13   : > { %988 = vmatprep.subr.bf16.mxu1 %v2205_v2  ;;  %1061 = vmatprep.subr.bf16.mxu0 %v2208_v4  ;;  %v1958_v22 = vmul.f32 -1.442695, %v2133_v17  ;;  %v1959_v23 = vmul.f32 -1.442695, %v2134_v18  ;;  %v1960_v24 = vmul.f32 -1.442695, %v2137_v19  ;;  %v2141_v25 = vunpack.c.l.bf16 %v2546_v21 }
  0x14   : > { %v1961_v26 = vmul.f32 -1.442695, %v2138_v20  ;;  %v2142_v27 = vunpack.c.h.bf16 %v2546_v21  ;;  %v2145_v31 = vunpack.c.l.bf16 %v2149_v30  ;;  %v2146_v32 = vunpack.c.h.bf16 %v2149_v30 }
  0x15   : > { %2161 = vmatmul.mubr.msk.bf16.vlgmr.msra.gmra.mxu0 %vm760_vm0, %v2201_v9  ;;  %2165 = vmatmul.mubr.msk.bf16.vlgmr.msra.gmra.mxu1 %vm760_vm0, %v2202_v10  ;;  %2215 = vpow2.f32 %v1958_v22  ;;  %v1962_v28 = vmul.f32 -1.442695, %v2141_v25 }
  0x16   : > { %1062 = vmatpush1.bf16.msra.mxu0 %v2206_v3  ;;  %989 = vmatpush1.bf16.msra.mxu1 %v2203_v6  ;;  %2217 = vpow2.f32 %v1959_v23  ;;  %v1963_v29 = vmul.f32 -1.442695, %v2142_v27  ;;  %v1964_v33 = vmul.f32 -1.442695, %v2145_v31  ;;  %v1965_v34 = vmul.f32 -1.442695, %v2146_v32 }
  0x17   : > { %1008 = vmatprep.mubr.bf16.mxu1 %v2399_v16  ;;  %990 = vmatprep.subr.bf16.mxu1 %v2211_v8  ;;  %2219 = vpow2.f32 %v1960_v24 }
  0x18   : > { %1063 = vmatprep.subr.bf16.mxu0 %v2214_v12  ;;  %1081 = vmatprep.mubr.bf16.mxu0 %v2399_v16  ;;  %2221 = vpow2.f32 %v1961_v26 }
  0x19   : > { %2223 = vpow2.f32 %v1962_v28 }
  0x1a   : > { %1064 = vmatpush1.bf16.msra.mxu0 %v2212_v11  ;;  %991 = vmatpush1.bf16.msra.mxu1 %v2209_v15  ;;  %2225 = vpow2.f32 %v1963_v29 }
  0x1b   : > { %2227 = vpow2.f32 %v1964_v33 }
  0x1c   : > { %2229 = vpow2.f32 %v1965_v34 }
  0x22   : > { %v2216_v35 = vpop.eup %2215 }
  0x23   : > { %v2218_v36 = vpop.eup %2217  ;;  %v681_v37 = vadd.f32 1.0, %v2216_v35 }
  0x24   : > { %v2220_v38 = vpop.eup %2219  ;;  %v682_v39 = vadd.f32 1.0, %v2218_v36 }
  0x25   : > { %v2222_v40 = vpop.eup %2221  ;;  %2231 = vrcp.f32 %v681_v37  ;;  %v683_v41 = vadd.f32 1.0, %v2220_v38 }
  0x26   : > { %2233 = vrcp.f32 %v682_v39  ;;  %v684_v42 = vadd.f32 1.0, %v2222_v40  ;;  %v2224_v43 = vpop.eup %2223 }
  0x27   : > { %2235 = vrcp.f32 %v683_v41  ;;  %v2226_v44 = vpop.eup %2225  ;;  %v685_v45 = vadd.f32 1.0, %v2224_v43 }
  0x28   : > { %2237 = vrcp.f32 %v684_v42  ;;  %v686_v46 = vadd.f32 1.0, %v2226_v44  ;;  %v2228_v47 = vpop.eup %2227 }
  0x29   : > { %2239 = vrcp.f32 %v685_v45  ;;  %v2230_v48 = vpop.eup %2229  ;;  %v687_v52 = vadd.f32 1.0, %v2228_v47 }
  0x2a   : > { %2241 = vrcp.f32 %v686_v46  ;;  %v688_v55 = vadd.f32 1.0, %v2230_v48  ;;  %v904_v48 = vlaneseq }
  0x2b   : > { %2243 = vrcp.f32 %v687_v52 }
  0x2c   : > { %2245 = vrcp.f32 %v688_v55  ;;  %v902_v55 = vld [vmem:[%s2905_s5] sm:$0xf] }
  0x32   : > { %v2232_v49 = vpop.eup %2231 }
  0x33   : > { %v2234_v50 = vpop.eup %2233  ;;  %v705_v51 = vmul.f32 %v2232_v49, %v2133_v17  ;;  %v905_v49 = vshrl.u32 %v904_v48, 7 }
  0x34   : > { %v2236_v53 = vpop.eup %2235  ;;  %v706_v54 = vmul.f32 %v2234_v50, %v2134_v18 }
  0x35   : > { %v2238_v56 = vpop.eup %2237  ;;  %v707_v58 = vmul.f32 %v2236_v53, %v2137_v19  ;;  %v914_v52 = vsub.s32 2, %v905_v49 }
  0x36   : > { %v713_v57 = vpack.c.bf16 %v706_v54, %v705_v51  ;;  %v708_v59 = vmul.f32 %v2238_v56, %v2138_v20  ;;  %v2240_v60 = vpop.eup %2239  ;;  %v2587_v51 = vsub.s32 0, %v905_v49 }
  0x37   : > { %v2242_v62 = vpop.eup %2241  ;;  %v709_v63 = vmul.f32 %v2240_v60, %v2141_v25 }
  0x38   : > { %1993 = vmatmul.mubr.msk.bf16.vlgmr.msra.gmra.mxu1 %vm760_vm0, %v713_v57  ;;  %1997 = vmatmul.mubr.msk.bf16.vlgmr.msra.gmra.mxu0 %vm760_vm0, %v713_v57  ;;  %v714_v61 = vpack.c.bf16 %v708_v59, %v707_v58  ;;  %v710_v0 = vmul.f32 %v2242_v62, %v2142_v27  ;;  %v2244_v1 = vpop.eup %2243  ;;  %v2592_v58 = vsub.s32 1, %v905_v49  ;;  %v918_v62 = vsub.s32 3, %v905_v49 }
  0x39   : > { %1018 = vmatprep.mubr.bf16.mxu1 %v2399_v16  ;;  %1091 = vmatprep.mubr.bf16.mxu0 %v2399_v16  ;;  %v2246_v3 = vpop.eup %2245  ;;  %v711_v4 = vmul.f32 %v2244_v1, %v2145_v31 }
  0x3a   : > { %v715_v2 = vpack.c.bf16 %v710_v0, %v709_v63  ;;  %v712_v5 = vmul.f32 %v2246_v3, %v2146_v32  ;;  %v2605_v3 = vrot.slane %v902_v55, %v914_v52 }
  0x3c   : > { %v716_v6 = vpack.c.bf16 %v712_v5, %v711_v4 }
  0x40   : > { %1994 = vmatmul.mubr.msk.bf16.gmra.mxu1 %vm760_vm0, %v714_v61  ;;  %1998 = vmatmul.mubr.msk.bf16.gmra.mxu0 %vm760_vm0, %v714_v61 }
  0x41   : > { %1028 = vmatprep.mubr.bf16.mxu1 %v2399_v16  ;;  %1101 = vmatprep.mubr.bf16.mxu0 %v2399_v16 }
  0x48   : > { %1995 = vmatmul.mubr.msk.bf16.gmra.mxu1 %vm760_vm0, %v715_v2  ;;  %1999 = vmatmul.mubr.msk.bf16.gmra.mxu0 %vm760_vm0, %v715_v2  ;;  %v2603_v2 = vrot.slane %v902_v55, %v2587_v51 }
  0x49   : > { %1038 = vmatprep.mubr.bf16.mxu1 %v2399_v16  ;;  %1111 = vmatprep.mubr.bf16.mxu0 %v2399_v16 }
  0x50   : > { %1996 = vmatmul.mubr.msk.bf16.gmra.mxu1 %vm760_vm0, %v716_v6  ;;  %2000 = vmatmul.mubr.msk.bf16.gmra.mxu0 %vm760_vm0, %v716_v6 }
  0xd5   : > { %v2162_v8 = vpop.f32.mrf.mxu0  ;;  %v2166_v10 = vpop.f32.mrf.mxu1 }
  0xd6   : > { %v816_v9 = vadd.f32 %v2162_v8, %v1966_v7  ;;  %v832_v11 = vadd.f32 %v2166_v10, %v1966_v7  ;;  %v2614_v10 = vrot.slane %v902_v55, %v2592_v58 }
  0xd7   : > { %v807_v12 = vpop.f32.mrf.mxu0  ;;  %v823_v15 = vpop.f32.mrf.mxu1 }
  0xd8   : > { %v1979_v13 = vmul.f32 -1.442695, %v816_v9  ;;  %v2569_v14 = vadd.f32 %v1966_v7, %v807_v12  ;;  %v1983_v17 = vmul.f32 -1.442695, %v832_v11  ;;  %v2571_v16 = vadd.f32 %v1966_v7, %v823_v15 }
  0xd9   : > { %v2163_v18 = vpop.f32.mrf.mxu0  ;;  %v2167_v21 = vpop.f32.mrf.mxu1 }
  0xda   : > { %2247 = vpow2.f32 %v1979_v13  ;;  %v1977_v19 = vmul.f32 -1.442695, %v2569_v14  ;;  %v2574_v20 = vadd.f32 %v2163_v18, %v1966_v7  ;;  %v1981_v22 = vmul.f32 -1.442695, %v2571_v16 }
  0xdb   : > { %2249 = vpow2.f32 %v1983_v17  ;;  %v2577_v23 = vadd.f32 %v2167_v21, %v1966_v7  ;;  %v810_v24 = vpop.f32.mrf.mxu0  ;;  %v826_v27 = vpop.f32.mrf.mxu1  ;;  %v2619_v17 = vrot.slane %v902_v55, %v918_v62 }
  0xdc   : > { %2251 = vpow2.f32 %v1977_v19  ;;  %v1980_v25 = vmul.f32 -1.442695, %v2574_v20  ;;  %v2580_v26 = vadd.f32 %v1966_v7, %v810_v24  ;;  %v2583_v29 = vadd.f32 %v1966_v7, %v826_v27 }
  0xdd   : > { %2253 = vpow2.f32 %v1981_v22  ;;  %v1984_v28 = vmul.f32 -1.442695, %v2577_v23 }
  0xde   : > { %2255 = vpow2.f32 %v1980_v25  ;;  %v1978_v30 = vmul.f32 -1.442695, %v2580_v26  ;;  %v1982_v31 = vmul.f32 -1.442695, %v2583_v29 }
  0xdf   : > { %2257 = vpow2.f32 %v1984_v28 }
  0xe0   : > { %2259 = vpow2.f32 %v1978_v30 }
  0xe1   : > { %2261 = vpow2.f32 %v1982_v31 }
  0xe7   : > { %v2248_v32 = vpop.eup %2247 }
  0xe8   : > { %v2250_v33 = vpop.eup %2249  ;;  %v864_v34 = vadd.f32 1.0, %v2248_v32 }
  0xe9   : > { %v2252_v35 = vpop.eup %2251  ;;  %v868_v36 = vadd.f32 1.0, %v2250_v33 }
  0xea   : > { %v2254_v37 = vpop.eup %2253  ;;  %2263 = vrcp.f32 %v864_v34  ;;  %v862_v38 = vadd.f32 1.0, %v2252_v35 }
  0xeb   : > { %v2256_v39 = vpop.eup %2255  ;;  %2265 = vrcp.f32 %v868_v36  ;;  %v866_v40 = vadd.f32 1.0, %v2254_v37 }
  0xec   : > { %v2258_v41 = vpop.eup %2257  ;;  %2267 = vrcp.f32 %v862_v38  ;;  %v865_v42 = vadd.f32 1.0, %v2256_v39 }
  0xed   : > { %v2260_v43 = vpop.eup %2259  ;;  %2269 = vrcp.f32 %v866_v40  ;;  %v869_v44 = vadd.f32 1.0, %v2258_v41 }
  0xee   : > { %v2262_v45 = vpop.eup %2261  ;;  %2271 = vrcp.f32 %v865_v42  ;;  %v863_v46 = vadd.f32 1.0, %v2260_v43 }
  0xef   : > { %2273 = vrcp.f32 %v869_v44  ;;  %v867_v47 = vadd.f32 1.0, %v2262_v45 }
  0xf0   : > { %2275 = vrcp.f32 %v863_v46 }
  0xf1   : > { %2277 = vrcp.f32 %v867_v47 }
  0xf7   : > { %v2264_v50 = vpop.eup %2263 }
  0xf8   : > { %v2266_v53 = vpop.eup %2265  ;;  %v888_v54 = vmul.f32 %v2264_v50, %v816_v9  ;;  %v1083_v15 = vpop.f32.mrf.mxu0 }
  0xf9   : > { %v2268_v56 = vpop.eup %2267  ;;  %v892_v57 = vmul.f32 %v2266_v53, %v832_v11 }
  0xfa   : > { %v2270_v59 = vpop.eup %2269  ;;  %v2101_v60 = vpack.c.bf16 %v888_v54, %v888_v54  ;;  %v886_v61 = vmul.f32 %v2268_v56, %v2569_v14  ;;  %v1010_v14 = vpop.f32.mrf.mxu1 }
  0xfb   : > { %v2272_v63 = vpop.eup %2271  ;;  %v2105_v0 = vpack.c.bf16 %v892_v57, %v892_v57  ;;  %v890_v1 = vmul.f32 %v2270_v59, %v2571_v16  ;;  %v1011_v19 = vadd.f32 %v1010_v14, %v2603_v2 }
  0xfc   : > { %v2274_v4 = vpop.eup %2273  ;;  %1456 = vst.msk [vmem:[%s2598_s19 + $0x8] sm:$0xf] %vm1453_vm1, %v2101_v60  ;;  %v2099_v5 = vpack.c.bf16 %v886_v61, %v886_v61  ;;  %v889_v6 = vmul.f32 %v2272_v63, %v2574_v20  ;;  %v2626_v20 = vadd.f32 %v1083_v15, %v2605_v3  ;;  %v1012_v22 = vpop.f32.mrf.mxu1 }
  0xfd   : > { %v2276_v7 = vpop.eup %2275  ;;  %1460 = vst.msk [vmem:[%s2598_s19 + $0x18] sm:$0xf] %vm1453_vm1, %v2105_v0  ;;  %v2103_v8 = vpack.c.bf16 %v890_v1, %v890_v1  ;;  %v893_v9 = vmul.f32 %v2274_v4, %v2577_v23  ;;  %v1085_v23 = vpop.f32.mrf.mxu0  ;;  %v2001_v25 = vmul.f32 -1.442695, %v1011_v19  ;;  %v2634_v27 = vadd.f32 %v1012_v22, %v2614_v10 }
  0xfe   : > { %v2278_v11 = vpop.eup %2277  ;;  %1454 = vst.msk [vmem:[%s2598_s19] sm:$0xf] %vm1453_vm1, %v2099_v5  ;;  %v2102_v12 = vpack.c.bf16 %v889_v6, %v889_v6  ;;  %v887_v13 = vmul.f32 %v2276_v7, %v2580_v26  ;;  %v2017_v26 = vmul.f32 -1.442695, %v2626_v20  ;;  %v1086_v28 = vadd.f32 %v1085_v23, %v2619_v17 }
  0xff   : > { %1458 = vst.msk [vmem:[%s2598_s19 + $0x10] sm:$0xf] %vm1453_vm1, %v2103_v8  ;;  %v2106_v16 = vpack.c.bf16 %v893_v9, %v893_v9  ;;  %v891_v18 = vmul.f32 %v2278_v11, %v2583_v29  ;;  %v1014_v29 = vpop.f32.mrf.mxu1  ;;  %v1087_v30 = vpop.f32.mrf.mxu0  ;;  %2279 = vpow2.f32 %v2001_v25  ;;  %v2009_v31 = vmul.f32 -1.442695, %v2634_v27 }
 0x100   : > { %1457 = vst.msk [vmem:[%s2598_s19 + $0xc] sm:$0xf] %vm1453_vm1, %v2102_v12  ;;  %v2100_v21 = vpack.c.bf16 %v887_v13, %v887_v13  ;;  %v1015_v32 = vadd.f32 %v1014_v29, %v2603_v2  ;;  %v2650_v33 = vadd.f32 %v1087_v30, %v2605_v3  ;;  %2281 = vpow2.f32 %v2017_v26 }
 0x101   : > { %1461 = vst.msk [vmem:[%s2598_s19 + $0x1c] sm:$0xf] %vm1453_vm1, %v2106_v16  ;;  %v2104_v24 = vpack.c.bf16 %v891_v18, %v891_v18  ;;  %v2123_v34 = vpack.c.bf16 %v1086_v28, %v1086_v28  ;;  %v1016_v35 = vpop.f32.mrf.mxu1  ;;  %v1089_v36 = vpop.f32.mrf.mxu0  ;;  %2283 = vpow2.f32 %v2009_v31 }
 0x102   : > { %1455 = vst.msk [vmem:[%s2598_s19 + $0x4] sm:$0xf] %vm1453_vm1, %v2100_v21  ;;  %v2002_v37 = vmul.f32 -1.442695, %v1015_v32  ;;  %v2018_v38 = vmul.f32 -1.442695, %v2650_v33  ;;  %v2654_v39 = vadd.f32 %v1016_v35, %v2614_v10  ;;  %v1090_v40 = vadd.f32 %v1089_v36, %v2619_v17 }
 0x103   : > { %1459 = vst.msk [vmem:[%s2598_s19 + $0x14] sm:$0xf] %vm1453_vm1, %v2104_v24  ;;  %1574 = vst.msk [vmem:[%s2646_s23] sm:$0xf] %vm1453_vm1, %v2123_v34  ;;  %v1020_v41 = vpop.f32.mrf.mxu1  ;;  %v1093_v42 = vpop.f32.mrf.mxu0  ;;  %s2756_s19 = scalar_lea.vmem %s2912_s12, %s2494_s16 }
 0x104   : > { %2285 = vpow2.f32 %v2002_v37  ;;  %v2010_v43 = vmul.f32 -1.442695, %v2654_v39  ;;  %v1021_v44 = vadd.f32 %v1020_v41, %v2603_v2  ;;  %v2662_v45 = vadd.f32 %v1093_v42, %v2605_v3 }
 0x105   : > { %2287 = vpow2.f32 %v2018_v38  ;;  %v2124_v46 = vpack.c.bf16 %v1090_v40, %v1090_v40  ;;  %v1022_v47 = vpop.f32.mrf.mxu1  ;;  %v1095_v48 = vpop.f32.mrf.mxu0 }
 0x106   : > { %2289 = vpow2.f32 %v2010_v43  ;;  %v2003_v49 = vmul.f32 -1.442695, %v1021_v44  ;;  %v2019_v50 = vmul.f32 -1.442695, %v2662_v45  ;;  %v2666_v52 = vadd.f32 %v1022_v47, %v2614_v10 }
 0x107   : > { %1575 = vst.msk [vmem:[%s2646_s23 + $0x4] sm:$0xf] %vm1453_vm1, %v2124_v46  ;;  %v1096_v53 = vadd.f32 %v1095_v48, %v2619_v17  ;;  %v1024_v54 = vpop.f32.mrf.mxu1  ;;  %v1097_v55 = vpop.f32.mrf.mxu0 }
 0x108   : > { %2291 = vpow2.f32 %v2003_v49  ;;  %v2011_v56 = vmul.f32 -1.442695, %v2666_v52  ;;  %v1025_v57 = vadd.f32 %v1024_v54, %v2603_v2  ;;  %v2674_v59 = vadd.f32 %v1097_v55, %v2605_v3 }
 0x109   : > { %2293 = vpow2.f32 %v2019_v50  ;;  %v2125_v60 = vpack.c.bf16 %v1096_v53, %v1096_v53  ;;  %v1026_v61 = vpop.f32.mrf.mxu1  ;;  %v1099_v62 = vpop.f32.mrf.mxu0  ;;  %v1282_v53 = vld [vmem:[%s2906_s6] sm:$0x3] }
 0x10a   : > { %2295 = vpow2.f32 %v2011_v56  ;;  %v2004_v63 = vmul.f32 -1.442695, %v1025_v57  ;;  %v2020_v0 = vmul.f32 -1.442695, %v2674_v59  ;;  %v2678_v1 = vadd.f32 %v1026_v61, %v2614_v10 }
 0x10b   : > { %1576 = vst.msk [vmem:[%s2646_s23 + $0x8] sm:$0xf] %vm1453_vm1, %v2125_v60  ;;  %v1100_v4 = vadd.f32 %v1099_v62, %v2619_v17  ;;  %v1030_v5 = vpop.f32.mrf.mxu1  ;;  %v1103_v6 = vpop.f32.mrf.mxu0 }
 0x10c   : > { %2297 = vpow2.f32 %v2004_v63  ;;  %v2012_v7 = vmul.f32 -1.442695, %v2678_v1  ;;  %v1031_v8 = vadd.f32 %v1030_v5, %v2603_v2  ;;  %v2280_v9 = vpop.eup %2279  ;;  %v2686_v16 = vadd.f32 %v1103_v6, %v2605_v3 }
 0x10d   : > { %2299 = vpow2.f32 %v2020_v0  ;;  %v2126_v11 = vpack.c.bf16 %v1100_v4, %v1100_v4  ;;  %v1032_v12 = vpop.f32.mrf.mxu1  ;;  %v1105_v13 = vpop.f32.mrf.mxu0  ;;  %v1146_v15 = vadd.f32 1.0, %v2280_v9 }
 0x10e   : > { %v2282_v14 = vpop.eup %2281  ;;  %2301 = vpow2.f32 %v2012_v7  ;;  %v2005_v21 = vmul.f32 -1.442695, %v1031_v8  ;;  %v1106_v22 = vadd.f32 %v1105_v13, %v2619_v17  ;;  %v2021_v34 = vmul.f32 -1.442695, %v2686_v16 }
 0x10f   : > { %v2284_v18 = vpop.eup %2283  ;;  %v1250_v19 = vadd.f32 1.0, %v2282_v14  ;;  %1577 = vst.msk [vmem:[%s2646_s23 + $0xc] sm:$0xf] %vm1453_vm1, %v2126_v11  ;;  %v1034_v23 = vpop.f32.mrf.mxu1  ;;  %2303 = vrcp.f32 %v1146_v15  ;;  %v2693_v37 = vadd.f32 %v1032_v12, %v2614_v10  ;;  %v2715_v7 = vrot.slane %v1282_v53, %v2587_v51  ;;  %v1283_v15 = vld [vmem:[%s2907_s7] sm:$0x3] }
 0x110   : > { %v1107_v24 = vpop.f32.mrf.mxu0  ;;  %v1194_v25 = vadd.f32 1.0, %v2284_v18  ;;  %v2127_v28 = vpack.c.bf16 %v1106_v22, %v1106_v22  ;;  %v1035_v49 = vadd.f32 %v1034_v23, %v2603_v2 }
 0x111   : > { %v2286_v26 = vpop.eup %2285  ;;  %2305 = vrcp.f32 %v1250_v19  ;;  %v1036_v29 = vpop.f32.mrf.mxu1  ;;  %v2013_v55 = vmul.f32 -1.442695, %v2693_v37  ;;  %v2709_v61 = vadd.f32 %v1107_v24, %v2605_v3 }
 0x112   : > { %v1109_v30 = vpop.f32.mrf.mxu0  ;;  %v2288_v31 = vpop.eup %2287  ;;  %2307 = vrcp.f32 %v1194_v25  ;;  %v1147_v32 = vadd.f32 1.0, %v2286_v26  ;;  %1578 = vst.msk [vmem:[%s2646_s23 + $0x10] sm:$0xf] %vm1453_vm1, %v2127_v28  ;;  %v2712_v63 = vadd.f32 %v1036_v29, %v2614_v10  ;;  %v2006_v13 = vmul.f32 -1.442695, %v1035_v49 }
 0x113   : > { %v2290_v35 = vpop.eup %2289  ;;  %v1251_v36 = vadd.f32 1.0, %v2288_v31  ;;  %2309 = vpow2.f32 %v2005_v21  ;;  %v1110_v38 = vadd.f32 %v1109_v30, %v2619_v17  ;;  %v1040_v44 = vpop.f32.mrf.mxu1  ;;  %v2022_v19 = vmul.f32 -1.442695, %v2709_v61 }
 0x114   : > { %v1113_v40 = vpop.f32.mrf.mxu0  ;;  %2311 = vrcp.f32 %v1147_v32  ;;  %v1195_v41 = vadd.f32 1.0, %v2290_v35  ;;  %v1041_v9 = vadd.f32 %v1040_v44, %v2603_v2  ;;  %v2739_v29 = vrot.slane %v1282_v53, %v2592_v58 }
 0x115   : > { %v2292_v42 = vpop.eup %2291  ;;  %2313 = vrcp.f32 %v1251_v36  ;;  %v2128_v43 = vpack.c.bf16 %v1110_v38, %v1110_v38  ;;  %v1042_v0 = vpop.f32.mrf.mxu1  ;;  %v2726_v21 = vadd.f32 %v1113_v40, %v2605_v3  ;;  %v2746_v35 = vrot.slane %v1283_v15, %v2592_v58 }
 0x116   : > { %v1115_v46 = vpop.f32.mrf.mxu0  ;;  %v2294_v47 = vpop.eup %2293  ;;  %2315 = vrcp.f32 %v1195_v41  ;;  %v1148_v48 = vadd.f32 1.0, %v2292_v42  ;;  %v2736_v23 = vadd.f32 %v1042_v0, %v2614_v10  ;;  %v2007_v30 = vmul.f32 -1.442695, %v1041_v9 }
 0x117   : > { %v2296_v50 = vpop.eup %2295  ;;  %v1252_v54 = vadd.f32 1.0, %v2294_v47  ;;  %2317 = vpow2.f32 %v2021_v34  ;;  %1579 = vst.msk [vmem:[%s2646_s23 + $0x14] sm:$0xf] %vm1453_vm1, %v2128_v43  ;;  %v1116_v56 = vadd.f32 %v1115_v46, %v2619_v17  ;;  %v1044_v24 = vpop.f32.mrf.mxu1  ;;  %v2743_v34 = vrot.slane %v1283_v15, %v2587_v51 }
 0x118   : > { %v2706_v57 = vpop.f32.mrf.mxu0  ;;  %2319 = vrcp.f32 %v1148_v48  ;;  %v1196_v60 = vadd.f32 1.0, %v2296_v50  ;;  %v2023_v51 = vmul.f32 -1.442695, %v2726_v21  ;;  %v1045_v58 = vadd.f32 %v1044_v24, %v2603_v2 }
 0x119   : > { %v2298_v62 = vpop.eup %2297  ;;  %2321 = vrcp.f32 %v1252_v54  ;;  %v2129_v4 = vpack.c.bf16 %v1116_v56, %v1116_v56  ;;  %v2015_v42 = vmul.f32 -1.442695, %v2736_v23  ;;  %v2769_v48 = vadd.f32 %v2706_v57, %v2605_v3 }
 0x11a   : > { %v1119_v5 = vpop.f32.mrf.mxu0  ;;  %v2300_v6 = vpop.eup %2299  ;;  %2323 = vrcp.f32 %v1196_v60  ;;  %v1149_v8 = vadd.f32 1.0, %v2298_v62  ;;  %v2008_v56 = vmul.f32 -1.442695, %v1045_v58 }
 0x11b   : > { %v2302_v11 = vpop.eup %2301  ;;  %v1253_v12 = vadd.f32 1.0, %v2300_v6  ;;  %2325 = vpow2.f32 %v2013_v55  ;;  %1580 = vst.msk [vmem:[%s2646_s23 + $0x18] sm:$0xf] %vm1453_vm1, %v2129_v4  ;;  %v1120_v14 = vadd.f32 %v1119_v5, %v2619_v17  ;;  %v2014_v17 = vmul.f32 -1.442695, %v2712_v63 }
 0x11c   : > { %2327 = vrcp.f32 %v1149_v8  ;;  %v1197_v18 = vadd.f32 1.0, %v2302_v11  ;;  %v2304_v22 = vpop.eup %2303 }
 0x11d   : > { %2329 = vrcp.f32 %v1253_v12  ;;  %v2130_v25 = vpack.c.bf16 %v1120_v14, %v1120_v14  ;;  %v2107_v28 = vpack.c.bf16 %v2304_v22, %v2304_v22 }
 0x11e   : > { %v2306_v26 = vpop.eup %2305  ;;  %2331 = vrcp.f32 %v1197_v18 }
 0x11f   : > { %v2308_v31 = vpop.eup %2307  ;;  %v1274_v32 = vmul.f32 %v2306_v26, %v2626_v20  ;;  %2333 = vpow2.f32 %v2006_v13  ;;  %1581 = vst.msk [vmem:[%s2646_s23 + $0x1c] sm:$0xf] %vm1453_vm1, %v2130_v25  ;;  %1494 = vst.msk [vmem:[%s2732_s15] sm:$0xf] %vm1453_vm1, %v2107_v28  ;;  %s2780_s23 = scalar_lea.vmem %s2909_s9, %s2494_s16 }
 0x120   : > { %v2310_v36 = vpop.eup %2309  ;;  %v1218_v20 = vmul.f32 %v2308_v31, %v2634_v27  ;;  %2335 = vpow2.f32 %v2022_v19 }
 0x121   : > { %v2312_v38 = vpop.eup %2311  ;;  %v2115_v40 = vpack.c.bf16 %v1274_v32, %v1274_v32  ;;  %v1150_v41 = vadd.f32 1.0, %v2310_v36  ;;  %2337 = vpow2.f32 %v2014_v17 }
 0x122   : > { %v2314_v43 = vpop.eup %2313  ;;  %v1288_v44 = vmul.f32 %v2715_v7, %v1218_v20  ;;  %v1320_v46 = vmul.f32 %v2739_v29, %v1218_v20  ;;  %v2108_v47 = vpack.c.bf16 %v2312_v38, %v2312_v38  ;;  %2339 = vpow2.f32 %v2007_v30 }
 0x123   : > { %v2316_v27 = vpop.eup %2315  ;;  %1534 = vst.msk [vmem:[%s2756_s19] sm:$0xf] %vm1453_vm1, %v2115_v40  ;;  %v1275_v2 = vmul.f32 %v2314_v43, %v2650_v33  ;;  %2341 = vrcp.f32 %v1150_v41 }
 0x124   : > { %v2318_v49 = vpop.eup %2317  ;;  %v1300_v50 = vadd.f32 %v2743_v34, %v1288_v44  ;;  %v1332_v53 = vadd.f32 %v2746_v35, %v1320_v46  ;;  %1495 = vst.msk [vmem:[%s2732_s15 + $0x4] sm:$0xf] %vm1453_vm1, %v2108_v47  ;;  %v1219_v54 = vmul.f32 %v2316_v27, %v2654_v39  ;;  %2343 = vpow2.f32 %v2023_v51 }
 0x125   : > { %v2320_v55 = vpop.eup %2319  ;;  %v2116_v3 = vpack.c.bf16 %v1275_v2, %v1275_v2  ;;  %v1254_v33 = vadd.f32 1.0, %v2318_v49  ;;  %2345 = vpow2.f32 %v2015_v42 }
 0x126   : > { %v2322_v57 = vpop.eup %2321  ;;  %v1308_v60 = vmul.f32 0.25, %v1300_v50  ;;  %v2091_v62 = vpack.c.bf16 %v1332_v53, %v1332_v53  ;;  %v1289_v0 = vmul.f32 %v2715_v7, %v1219_v54  ;;  %v1321_v39 = vmul.f32 %v2739_v29, %v1219_v54 }
 0x127   : > { %v2324_v4 = vpop.eup %2323  ;;  %1535 = vst.msk [vmem:[%s2756_s19 + $0x4] sm:$0xf] %vm1453_vm1, %v2116_v3  ;;  %v2109_v5 = vpack.c.bf16 %v2320_v55, %v2320_v55  ;;  %v1276_v6 = vmul.f32 %v2322_v57, %v2662_v45  ;;  %2347 = vrcp.f32 %v1254_v33  ;;  %v2024_v45 = vmul.f32 -1.442695, %v2769_v48 }
 0x128   : > { %v2326_v8 = vpop.eup %2325  ;;  %v2083_v9 = vpack.c.bf16 %v1308_v60, %v1308_v60  ;;  %1413 = vst.msk [vmem:[%s2780_s23] sm:$0xf] %vm1372_vm2, %v2091_v62  ;;  %v1301_v11 = vadd.f32 %v2743_v34, %v1289_v0  ;;  %v1333_v12 = vadd.f32 %v2746_v35, %v1321_v39  ;;  %v1220_v13 = vmul.f32 %v2324_v4, %v2666_v52  ;;  %v1046_v52 = vpop.f32.mrf.mxu1 }
 0x129   : > { %v2328_v14 = vpop.eup %2327  ;;  %1496 = vst.msk [vmem:[%s2732_s15 + $0x8] sm:$0xf] %vm1453_vm1, %v2109_v5  ;;  %v2117_v15 = vpack.c.bf16 %v1276_v6, %v1276_v6  ;;  %v1198_v18 = vadd.f32 1.0, %v2326_v8  ;;  %2349 = vpow2.f32 %v2008_v56 }
 0x12a   : > { %v2330_v19 = vpop.eup %2329  ;;  %1373 = vst.msk [vmem:[%s2788_s29] sm:$0xf] %vm1372_vm2, %v2083_v9  ;;  %v1309_v22 = vmul.f32 0.25, %v1301_v11  ;;  %v2092_v17 = vpack.c.bf16 %v1333_v12, %v1333_v12  ;;  %v1290_v24 = vmul.f32 %v2715_v7, %v1220_v13  ;;  %v1322_v25 = vmul.f32 %v2739_v29, %v1220_v13 }
 0x12b   : > { %v2332_v26 = vpop.eup %2331  ;;  %1536 = vst.msk [vmem:[%s2756_s19 + $0x8] sm:$0xf] %vm1453_vm1, %v2117_v15  ;;  %v2110_v28 = vpack.c.bf16 %v2328_v14, %v2328_v14  ;;  %v1277_v30 = vmul.f32 %v2330_v19, %v2674_v59  ;;  %2351 = vrcp.f32 %v1198_v18  ;;  %v2816_v59 = vadd.f32 %v1046_v52, %v2614_v10 }
 0x12c   : > { %v2334_v31 = vpop.eup %2333  ;;  %v2084_v32 = vpack.c.bf16 %v1309_v22, %v1309_v22  ;;  %1414 = vst.msk [vmem:[%s2780_s23 + $0x4] sm:$0xf] %vm1372_vm2, %v2092_v17  ;;  %v1302_v36 = vadd.f32 %v2743_v34, %v1290_v24  ;;  %v1334_v20 = vadd.f32 %v2746_v35, %v1322_v25  ;;  %v1221_v51 = vmul.f32 %v2332_v26, %v2678_v1 }
 0x12d   : > { %v2336_v58 = vpop.eup %2335  ;;  %1497 = vst.msk [vmem:[%s2732_s15 + $0xc] sm:$0xf] %vm1453_vm1, %v2110_v28  ;;  %v2118_v38 = vpack.c.bf16 %v1277_v30, %v1277_v30  ;;  %v1151_v40 = vadd.f32 1.0, %v2334_v31  ;;  %2353 = vpow2.f32 %v2024_v45  ;;  %v2016_v3 = vmul.f32 -1.442695, %v2816_v59 }
 0x12e   : > { %v2338_v41 = vpop.eup %2337  ;;  %1374 = vst.msk [vmem:[%s2788_s29 + $0x4] sm:$0xf] %vm1372_vm2, %v2084_v32  ;;  %v1310_v42 = vmul.f32 0.25, %v1302_v36  ;;  %v2093_v43 = vpack.c.bf16 %v1334_v20, %v1334_v20  ;;  %v1291_v44 = vmul.f32 %v2715_v7, %v1221_v51  ;;  %v1323_v46 = vmul.f32 %v2739_v29, %v1221_v51 }
 0x12f   : > { %v2340_v1 = vpop.eup %2339  ;;  %1537 = vst.msk [vmem:[%s2756_s19 + $0xc] sm:$0xf] %vm1453_vm1, %v2118_v38  ;;  %2355 = vrcp.f32 %v1151_v40  ;;  %v1255_v47 = vadd.f32 1.0, %v2336_v58  ;;  %v1199_v27 = vadd.f32 1.0, %v2338_v41 }
 0x130   : > { %v2342_v2 = vpop.eup %2341  ;;  %v2085_v10 = vpack.c.bf16 %v1310_v42, %v1310_v42  ;;  %1415 = vst.msk [vmem:[%s2780_s23 + $0x8] sm:$0xf] %vm1372_vm2, %v2093_v43  ;;  %v1303_v49 = vadd.f32 %v2743_v34, %v1291_v44  ;;  %v1335_v50 = vadd.f32 %v2746_v35, %v1323_v46  ;;  %v1152_v53 = vadd.f32 1.0, %v2340_v1 }
 0x131   : > { %v2344_v54 = vpop.eup %2343  ;;  %v2111_v55 = vpack.c.bf16 %v2342_v2, %v2342_v2  ;;  %2357 = vrcp.f32 %v1255_v47 }
 0x132   : > { %v2346_v33 = vpop.eup %2345  ;;  %1375 = vst.msk [vmem:[%s2788_s29 + $0x8] sm:$0xf] %vm1372_vm2, %v2085_v10  ;;  %v1311_v56 = vmul.f32 0.25, %v1303_v49  ;;  %v2094_v57 = vpack.c.bf16 %v1335_v50, %v1335_v50  ;;  %2359 = vrcp.f32 %v1199_v27  ;;  %v1256_v60 = vadd.f32 1.0, %v2344_v54 }
 0x133   : > { %1498 = vst.msk [vmem:[%s2732_s15 + $0x10] sm:$0xf] %vm1453_vm1, %v2111_v55  ;;  %2361 = vrcp.f32 %v1152_v53  ;;  %v1200_v62 = vadd.f32 1.0, %v2346_v33 }
 0x134   : > { %v2348_v0 = vpop.eup %2347  ;;  %v2086_v39 = vpack.c.bf16 %v1311_v56, %v1311_v56  ;;  %1416 = vst.msk [vmem:[%s2780_s23 + $0xc] sm:$0xf] %vm1372_vm2, %v2094_v57  ;;  %2363 = vrcp.f32 %v1256_v60 }
 0x135   : > { %v1278_v4 = vmul.f32 %v2348_v0, %v2686_v16  ;;  %2365 = vrcp.f32 %v1200_v62 }
 0x136   : > { %v2350_v5 = vpop.eup %2349  ;;  %1376 = vst.msk [vmem:[%s2788_s29 + $0xc] sm:$0xf] %vm1372_vm2, %v2086_v39  ;;  %2367 = vpow2.f32 %v2016_v3 }
 0x137   : > { %v2119_v6 = vpack.c.bf16 %v1278_v4, %v1278_v4  ;;  %v1153_v8 = vadd.f32 1.0, %v2350_v5 }
 0x138   : > { %v2352_v9 = vpop.eup %2351 }
 0x139   : > { %1538 = vst.msk [vmem:[%s2756_s19 + $0x10] sm:$0xf] %vm1453_vm1, %v2119_v6  ;;  %v1222_v11 = vmul.f32 %v2352_v9, %v2693_v37  ;;  %2369 = vrcp.f32 %v1153_v8 }
 0x13a   : > { %v2354_v12 = vpop.eup %2353 }
 0x13b   : > { %v1292_v13 = vmul.f32 %v2715_v7, %v1222_v11  ;;  %v1324_v14 = vmul.f32 %v2739_v29, %v1222_v11  ;;  %v1257_v16 = vadd.f32 1.0, %v2354_v12 }
 0x13c   : > { %v2356_v15 = vpop.eup %2355 }
 0x13d   : > { %v1304_v18 = vadd.f32 %v2743_v34, %v1292_v13  ;;  %v1336_v45 = vadd.f32 %v2746_v35, %v1324_v14  ;;  %v2112_v19 = vpack.c.bf16 %v2356_v15, %v2356_v15  ;;  %2371 = vrcp.f32 %v1257_v16 }
 0x13e   : > { %v2358_v22 = vpop.eup %2357 }
 0x13f   : > { %v2360_v17 = vpop.eup %2359  ;;  %v1312_v24 = vmul.f32 0.25, %v1304_v18  ;;  %v2095_v37 = vpack.c.bf16 %v1336_v45, %v1336_v45  ;;  %1499 = vst.msk [vmem:[%s2732_s15 + $0x14] sm:$0xf] %vm1453_vm1, %v2112_v19  ;;  %v1279_v25 = vmul.f32 %v2358_v22, %v2709_v61 }
 0x140   : > { %v2362_v52 = vpop.eup %2361  ;;  %v1223_v26 = vmul.f32 %v2360_v17, %v2712_v63 }
 0x141   : > { %v2364_v28 = vpop.eup %2363  ;;  %v2087_v30 = vpack.c.bf16 %v1312_v24, %v1312_v24  ;;  %1417 = vst.msk [vmem:[%s2780_s23 + $0x10] sm:$0xf] %vm1372_vm2, %v2095_v37  ;;  %v2120_v31 = vpack.c.bf16 %v1279_v25, %v1279_v25  ;;  %v2113_v32 = vpack.c.bf16 %v2362_v52, %v2362_v52 }
 0x142   : > { %v2366_v36 = vpop.eup %2365  ;;  %v1293_v20 = vmul.f32 %v2715_v7, %v1223_v26  ;;  %v1325_v51 = vmul.f32 %v2739_v29, %v1223_v26  ;;  %v1280_v58 = vmul.f32 %v2364_v28, %v2726_v21 }
 0x143   : > { %v2368_v38 = vpop.eup %2367  ;;  %1377 = vst.msk [vmem:[%s2788_s29 + $0x10] sm:$0xf] %vm1372_vm2, %v2087_v30  ;;  %v1224_v61 = vmul.f32 %v2366_v36, %v2736_v23 }
 0x144   : > { %1539 = vst.msk [vmem:[%s2756_s19 + $0x14] sm:$0xf] %vm1453_vm1, %v2120_v31  ;;  %1500 = vst.msk [vmem:[%s2732_s15 + $0x18] sm:$0xf] %vm1453_vm1, %v2113_v32  ;;  %v1305_v63 = vadd.f32 %v2743_v34, %v1293_v20  ;;  %v1337_v40 = vadd.f32 %v2746_v35, %v1325_v51  ;;  %v2121_v41 = vpack.c.bf16 %v1280_v58, %v1280_v58  ;;  %v1201_v42 = vadd.f32 1.0, %v2368_v38 }
 0x145   : > { %v1294_v43 = vmul.f32 %v2715_v7, %v1224_v61  ;;  %v1326_v21 = vmul.f32 %v2739_v29, %v1224_v61 }
 0x146   : > { %v2370_v44 = vpop.eup %2369  ;;  %v1313_v46 = vmul.f32 0.25, %v1305_v63  ;;  %v2096_v1 = vpack.c.bf16 %v1337_v40, %v1337_v40  ;;  %1540 = vst.msk [vmem:[%s2756_s19 + $0x18] sm:$0xf] %vm1453_vm1, %v2121_v41  ;;  %2373 = vrcp.f32 %v1201_v42 }
 0x147   : > { %v1306_v23 = vadd.f32 %v2743_v34, %v1294_v43  ;;  %v1338_v47 = vadd.f32 %v2746_v35, %v1326_v21  ;;  %v2114_v27 = vpack.c.bf16 %v2370_v44, %v2370_v44 }
 0x148   : > { %v2088_v2 = vpack.c.bf16 %v1313_v46, %v1313_v46  ;;  %1418 = vst.msk [vmem:[%s2780_s23 + $0x14] sm:$0xf] %vm1372_vm2, %v2096_v1 }
 0x149   : > { %v1314_v10 = vmul.f32 0.25, %v1306_v23  ;;  %v2097_v49 = vpack.c.bf16 %v1338_v47, %v1338_v47  ;;  %1501 = vst.msk [vmem:[%s2732_s15 + $0x1c] sm:$0xf] %vm1453_vm1, %v2114_v27 }
 0x14a   : > { %v2372_v50 = vpop.eup %2371  ;;  %1378 = vst.msk [vmem:[%s2788_s29 + $0x14] sm:$0xf] %vm1372_vm2, %v2088_v2 }
 0x14b   : > { %v2089_v53 = vpack.c.bf16 %v1314_v10, %v1314_v10  ;;  %1419 = vst.msk [vmem:[%s2780_s23 + $0x18] sm:$0xf] %vm1372_vm2, %v2097_v49  ;;  %v1281_v54 = vmul.f32 %v2372_v50, %v2769_v48 }
 0x14d   : > { %1379 = vst.msk [vmem:[%s2788_s29 + $0x18] sm:$0xf] %vm1372_vm2, %v2089_v53  ;;  %v2122_v55 = vpack.c.bf16 %v1281_v54, %v1281_v54 }
 0x14f   : > { %1541 = vst.msk [vmem:[%s2756_s19 + $0x1c] sm:$0xf] %vm1453_vm1, %v2122_v55 }
 0x153   : > { %v2374_v3 = vpop.eup %2373 }
 0x154   : > { %v1225_v33 = vmul.f32 %v2374_v3, %v2816_v59 }
 0x156   : > { %v1295_v56 = vmul.f32 %v2715_v7, %v1225_v33  ;;  %v1327_v57 = vmul.f32 %v2739_v29, %v1225_v33 }
 0x158   : > { %v1307_v60 = vadd.f32 %v2743_v34, %v1295_v56  ;;  %v1339_v62 = vadd.f32 %v2746_v35, %v1327_v57 }
 0x15a   : > { %v1315_v0 = vmul.f32 0.25, %v1307_v60  ;;  %v2098_v39 = vpack.c.bf16 %v1339_v62, %v1339_v62 }
 0x15c   : > { %v2090_v4 = vpack.c.bf16 %v1315_v0, %v1315_v0  ;;  %1420 = vst.msk [vmem:[%s2780_s23 + $0x1c] sm:$0xf] %vm1372_vm2, %v2098_v39 }
 0x15e   : > { %1380 = vst.msk [vmem:[%s2788_s29 + $0x1c] sm:$0xf] %vm1372_vm2, %v2090_v4 }
 0x15f PF: > { %s24_s27 = sadd.s32 1, %s2397_s27   ;;  %s2914_s25 = smov %s2393_s26 }
 0x160   : > { %p21_p5 = scmp.ge.s32.totalorder %s24_s27, 4   ;;  %s2915_s26 = smov %s2917_s28 }
 0x162   :  { %23 = sbr.rel (!%p21_p5) target bundleno = 2 (0x2), region = 145 }

</bundles_post_ra>
